<compile_context>
chip_gen: v7x
topology: tpu7x:2x2x1
jax: 0.10.0
libtpu: 0.0.40
codegen_flags: <defaults>
</compile_context>

<pallas_src>
import functools

import jax
import jax.numpy as jnp
from jax.experimental import pallas as pl
from jax.experimental.pallas import tpu as pltpu

# Raised scoped-VMEM limit (v5e default is only 16 MiB); well under physical
# VMEM on every generation (v5e/v6e 128 MiB, v7x 64 MiB).
_VMEM_LIMIT_BYTES = 32 << 20
# Budget for the fused attention-chain working set (scratch + 2x double-
# buffered input + double-buffered output), kept well under the limit above.
_CHAIN_VMEM_BUDGET = 24 << 20


# ----------------------------------------------------------------------------
# Kernel 1: LayerNorm (torch-style: mean, unbiased std, a*(x-mean)/(std+eps)+b)
# ----------------------------------------------------------------------------
def _layer_norm_kernel(eps, x_ref, g_ref, b_ref, o_ref):
    x = x_ref[...].astype(jnp.float32)                        # (TR, D)
    d = x.shape[-1]
    mean = jnp.mean(x, axis=-1, keepdims=True)
    xc = x - mean
    # torch.Tensor.std() is the unbiased (Bessel-corrected) estimator.
    var = jnp.sum(xc * xc, axis=-1, keepdims=True) / (d - 1)
    std = jnp.sqrt(var)
    # One reciprocal per row (exact, to stay bit-close to the reference)
    # instead of D per-element divides; the broadcast multiply is cheap VALU.
    inv = pl.reciprocal(std + eps, approx=False)              # (TR, 1)
    y = g_ref[...] * (xc * inv) + b_ref[...]
    o_ref[...] = y.astype(o_ref.dtype)


def layer_norm(x, gamma, beta, *, eps: float = 1e-6):
    """LayerNorm over the last axis of x (any leading shape)."""
    orig_shape = x.shape
    d = orig_shape[-1]
    x2 = x.reshape(-1, d)
    rows = x2.shape[0]

    # Sublane alignment: 8 rows for f32, 16 for bf16, 32 for 8-bit dtypes.
    itemsize = jnp.dtype(x2.dtype).itemsize
    align = max(8, 32 // max(itemsize, 1))

    # Mem-bound kernel -> target ~2 MiB activation blocks instead of tiny ones.
    cap_rows = max(align, ((2 << 20) // (4 * d)) // align * align)
    rows_aligned = ((rows + align - 1) // align) * align
    tr = min(cap_rows, rows_aligned)
    rows_pad = ((rows + tr - 1) // tr) * tr
    if rows_pad != rows:
        # Pad (instead of one giant full-array block) so every block is tiled.
        x2 = jnp.pad(x2, ((0, rows_pad - rows), (0, 0)))

    gamma2 = gamma.reshape(1, d).astype(jnp.float32)
    beta2 = beta.reshape(1, d).astype(jnp.float32)

    out = pl.pallas_call(
        functools.partial(_layer_norm_kernel, float(eps)),
        out_shape=jax.ShapeDtypeStruct((rows_pad, d), x.dtype),
        grid=(rows_pad // tr,),
        in_specs=[
            pl.BlockSpec((tr, d), lambda i: (i, 0)),     # activation tile
            pl.BlockSpec((1, d), lambda i: (0, 0)),      # gamma (tiny, reused)
            pl.BlockSpec((1, d), lambda i: (0, 0)),      # beta
        ],
        out_specs=pl.BlockSpec((tr, d), lambda i: (i, 0)),
        compiler_params=pltpu.CompilerParams(
            dimension_semantics=("parallel",),
            vmem_limit_bytes=_VMEM_LIMIT_BYTES,
        ),
    )(x2, gamma2, beta2)
    if rows_pad != rows:
        out = out[:rows]
    return out.reshape(orig_shape)


# ----------------------------------------------------------------------------
# Kernel 2a: fused attention-chain product  p <- attn_{L-1} @ ... @ attn_0
# ----------------------------------------------------------------------------
def _attn_chain_kernel(attn_ref, out_ref, p_ref):
    # attn_ref: (G, S, S) attention block of the current layer, current group
    # p_ref:    (G, S, S) f32 running product, resident across the layer axis
    l = pl.program_id(1)
    a = attn_ref[...].astype(jnp.float32)

    @pl.when(l == 0)
    def _init():
        p_ref[...] = a

    @pl.when(l > 0)
    def _chain():
        # Batched (G) matmul on the MXU with an f32 result: p <- attn_l @ p.
        p_ref[...] = jnp.einsum(
            "gij,gjk->gik", a, p_ref[...],
            preferred_element_type=jnp.float32,
        )

    @pl.when(l == pl.num_programs(1) - 1)
    def _store():
        out_ref[...] = p_ref[...].astype(out_ref.dtype)


def attn_chain_fused(attn_stack):
    """Chained product for attn_stack of shape (L, B, H, S, S)."""
    L, B, H, S, _ = attn_stack.shape
    BH = B * H
    a = attn_stack.reshape(L, BH, S, S)

    # Block G (batch*head) matrices per grid step; budget VMEM as
    # scratch + 2x double-buffered input + double-buffered output (all ~f32).
    per_mat = S * S * 4
    g = max(1, min(BH, _CHAIN_VMEM_BUDGET // (5 * per_mat)))
    while BH % g != 0:
        g -= 1

    out = pl.pallas_call(
        _attn_chain_kernel,
        out_shape=jax.ShapeDtypeStruct((BH, S, S), attn_stack.dtype),
        grid=(BH // g, L),                    # layer (reduction) axis last
        in_specs=[
            pl.BlockSpec((pl.Squeezed(), g, S, S),
                         lambda gi, l: (l, gi, 0, 0)),
        ],
        out_specs=pl.BlockSpec((g, S, S), lambda gi, l: (gi, 0, 0)),
        scratch_shapes=[pltpu.VMEM((g, S, S), jnp.float32)],
        compiler_params=pltpu.CompilerParams(
            dimension_semantics=("parallel", "arbitrary"),
            vmem_limit_bytes=_VMEM_LIMIT_BYTES,
        ),
    )(a)
    return out.reshape(B, H, S, S)


# ----------------------------------------------------------------------------
# Kernel 2b: tiled batched matmul fallback (large S that won't fit the fused
# path's per-group VMEM budget).  Bigger, MXU-shaped tiles, full-width output
# block when affordable, squeezed leading (batch*head) dim.
# ----------------------------------------------------------------------------
def _bmm_kernel(a_ref, b_ref, o_ref, acc_ref):
    @pl.when(pl.program_id(3) == 0)
    def _init():
        acc_ref[...] = jnp.zeros_like(acc_ref)

    acc_ref[...] += jnp.dot(a_ref[...], b_ref[...],
                            preferred_element_type=jnp.float32)

    @pl.when(pl.program_id(3) == pl.num_programs(3) - 1)
    def _store():
        o_ref[...] = acc_ref[...].astype(o_ref.dtype)


def _tile(n: int, cap: int, mult: int = 128) -> int:
    """Largest divisor of n that is a multiple of `mult` and <= cap, else n."""
    if n % mult != 0:
        return n                       # full-extent block is always legal
    t = min(cap, n)
    t -= t % mult
    while t > 0 and n % t != 0:
        t -= mult
    return max(t, mult)


def attn_chain_matmul(attn_new, p_attn):
    """torch.matmul(attn_new, p_attn) for (B, H, S, S) tensors."""
    B, H, S, _ = attn_new.shape
    a = attn_new.reshape(B * H, S, S)
    b = p_attn.reshape(B * H, S, S)
    tm = _tile(S, 256)
    tk = _tile(S, 512)
    tn = S if S <= 2048 else _tile(S, 256)   # full-width output block when cheap

    out = pl.pallas_call(
        _bmm_kernel,
        out_shape=jax.ShapeDtypeStruct((B * H, S, S), attn_new.dtype),
        grid=(B * H, S // tm, S // tn, S // tk),
        in_specs=[
            pl.BlockSpec((pl.Squeezed(), tm, tk),
                         lambda bh, i, j, k: (bh, i, k)),
            pl.BlockSpec((pl.Squeezed(), tk, tn),
                         lambda bh, i, j, k: (bh, k, j)),
        ],
        out_specs=pl.BlockSpec((pl.Squeezed(), tm, tn),
                               lambda bh, i, j, k: (bh, i, j)),
        scratch_shapes=[pltpu.VMEM((tm, tn), jnp.float32)],
        compiler_params=pltpu.CompilerParams(
            dimension_semantics=("parallel", "parallel", "parallel", "arbitrary"),
            vmem_limit_bytes=_VMEM_LIMIT_BYTES,
        ),
    )(a, b)
    return out.reshape(B, H, S, S)


def attn_chain(attns):
    """p_attn = attn_{L-1} @ ... @ attn_0 (each (B, H, S, S))."""
    if len(attns) == 1:
        return attns[0]
    S = attns[0].shape[-1]
    if 5 * S * S * 4 <= _CHAIN_VMEM_BUDGET:
        return attn_chain_fused(jnp.stack(attns, axis=0))
    # Very long sequences: fall back to per-layer tiled bmm kernels.
    p = attns[0]
    for a in attns[1:]:
        p = attn_chain_matmul(a, p)
    return p


# ----------------------------------------------------------------------------
# Encoder.forward
# ----------------------------------------------------------------------------
def encoder_forward(x, mask, layer_fns, norm_gamma, norm_beta, *, eps: float = 1e-6):
    """Mirrors Encoder.forward: apply layers, chain attention, final LayerNorm.

    layer_fns: list of callables (x, mask) -> x  or  (x, attn).
    """
    # TODO(synk): the per-layer module (`layer` in Encoder.__init__, e.g. an
    # EncoderLayer with self-attention + FFN) is injected at construction and
    # is not defined in this spec, so it cannot be translated here.
    attns = []
    for layer_fn in layer_fns:
        out = layer_fn(x, mask)
        if isinstance(out, tuple):
            x, attn_l = out[0], out[1]
            attns.append(attn_l)
        else:
            x = out
    p_attn = attn_chain(attns) if attns else None
    return layer_norm(x, norm_gamma, norm_beta, eps=eps), p_attn


# ----------------------------------------------------------------------------
# Demo / self-check
# ----------------------------------------------------------------------------
if __name__ == "__main__":
    key = jax.random.PRNGKey(0)
    B, H, S, D = 2, 2, 128, 128          # lane-dense last dims (multiples of 128)
    N_LAYERS = 3
    EPS = 1e-6

    k_x, k_attn, k_g = jax.random.split(key, 3)
    x = jax.random.normal(k_x, (B, S, D), dtype=jnp.float32)
    mask = jnp.ones((B, 1, 1, S), dtype=jnp.float32)

    # Deterministic stand-in layers: scale x, return a fixed row-stochastic
    # attention map per layer (real EncoderLayer is injected, not in the spec).
    attn_keys = jax.random.split(k_attn, N_LAYERS)
    layer_scales = [1.0 + 0.01 * i for i in range(N_LAYERS)]
    layer_attns = [
        jax.nn.softmax(jax.random.normal(ak, (B, H, S, S), jnp.float32), axis=-1)
        for ak in attn_keys
    ]

    def make_layer(scale, attn):
        def layer_fn(x_in, m):
            del m
            return x_in * scale, attn
        return layer_fn

    layer_fns = [make_layer(s, a) for s, a in zip(layer_scales, layer_attns)]

    gamma = jnp.ones((D,), jnp.float32) + 0.05 * jax.random.normal(k_g, (D,), jnp.float32)
    beta = 0.1 * jnp.ones((D,), jnp.float32)

    out, p_attn = encoder_forward(x, mask, layer_fns, gamma, beta, eps=EPS)
    out = jax.block_until_ready(out)
    p_attn = jax.block_until_ready(p_attn)

    # ---- plain-JAX reference (same semantics as the PyTorch module) ----
    xr = x
    pr = None
    for li, fn in enumerate(layer_fns):
        xr, attn_l = fn(xr, mask)
        pr = attn_l if li == 0 else jnp.einsum("bhij,bhjk->bhik", attn_l, pr)
    mean = xr.mean(-1, keepdims=True)
    std = jnp.sqrt(jnp.sum((xr - mean) ** 2, -1, keepdims=True) / (D - 1))  # unbiased
    ref_out = gamma * (xr - mean) / (std + EPS) + beta

    assert out.shape == (B, S, D)
    assert p_attn.shape == (B, H, S, S)
    assert jnp.allclose(out, ref_out, atol=1e-4, rtol=1e-4), "LayerNorm mismatch"
    assert jnp.allclose(p_attn, pr, atol=1e-3, rtol=1e-3), "attention-chain mismatch"

    print("KERNEL_OK")
</pallas_src>

<mosaic_0001>
module attributes {stable_mosaic.version = 11 : i64} {
  func.func @_attn_chain_kernel(%arg0: i32, %arg1: i32, %arg2: memref<1x4x128x128xf32, #tpu.memory_space<vmem>>, %arg3: memref<4x128x128xf32, #tpu.memory_space<vmem>>, %arg4: memref<4x128x128xf32, #tpu.memory_space<vmem>>) attributes {dimension_semantics = [#tpu.dimension_semantics<parallel>, #tpu.dimension_semantics<arbitrary>], iteration_bounds = array<i64: 1, 3>, scalar_prefetch = 0 : i64, scratch_operands = 1 : i64, tpu.core_type = #tpu.core_type<tc>, window_params = [{transform_indices = @transform_0, window_bounds = array<i64: 1, 4, 128, 128>}, {transform_indices = @transform_1, window_bounds = array<i64: 4, 128, 128>}]} {
    %c0 = arith.constant 0 : index
    %c0_0 = arith.constant 0 : index
    %c0_1 = arith.constant 0 : index
    %c0_2 = arith.constant 0 : index
    %0 = vector.load %arg2[%c0, %c0_0, %c0_1, %c0_2] : memref<1x4x128x128xf32, #tpu.memory_space<vmem>>, vector<1x4x128x128xf32>
    %1 = vector.shape_cast %0 : vector<1x4x128x128xf32> to vector<4x128x128xf32>
    %c0_i32 = arith.constant 0 : i32
    %2 = arith.cmpi eq, %arg1, %c0_i32 : i32
    %3 = arith.extui %2 : i1 to i32
    %c0_i32_3 = arith.constant 0 : i32
    %4 = arith.cmpi ne, %3, %c0_i32_3 : i32
    scf.if %4 {
      %c0_7 = arith.constant 0 : index
      %c0_8 = arith.constant 0 : index
      %c0_9 = arith.constant 0 : index
      %11 = vector.load %arg4[%c0_7, %c0_8, %c0_9] : memref<4x128x128xf32, #tpu.memory_space<vmem>>, vector<4x128x128xf32>
      tpu.vector_store %arg4[%c0_7, %c0_8, %c0_9], %1 {strides = array<i32>} : memref<4x128x128xf32, #tpu.memory_space<vmem>>, vector<4x128x128xf32>,
    } else {
    }
    %c0_i32_4 = arith.constant 0 : i32
    %5 = arith.cmpi sgt, %arg1, %c0_i32_4 : i32
    %6 = arith.extui %5 : i1 to i32
    %c0_i32_5 = arith.constant 0 : i32
    %7 = arith.cmpi ne, %6, %c0_i32_5 : i32
    scf.if %7 {
      %c0_7 = arith.constant 0 : index
      %c0_8 = arith.constant 0 : index
      %c0_9 = arith.constant 0 : index
      %11 = vector.load %arg4[%c0_7, %c0_8, %c0_9] : memref<4x128x128xf32, #tpu.memory_space<vmem>>, vector<4x128x128xf32>
      "tpu.trace_start"() <{level = 10 : i32, message = "gij,gjk->gik"}> : () -> ()
      %cst = arith.constant dense<0.000000e+00> : vector<4x128x128xf32>
      %12 = tpu.matmul %1, %11, %cst {dimension_numbers = #tpu.dot_dimension_numbers<[2], [1], [1], [2], [0, 0, 0, 1, 1, 2], [0], [0]>} : vector<4x128x128xf32>, vector<4x128x128xf32>, vector<4x128x128xf32> -> vector<4x128x128xf32>
      "tpu.trace_stop"() : () -> ()
      %c0_10 = arith.constant 0 : index
      %c0_11 = arith.constant 0 : index
      %c0_12 = arith.constant 0 : index
      %13 = vector.load %arg4[%c0_10, %c0_11, %c0_12] : memref<4x128x128xf32, #tpu.memory_space<vmem>>, vector<4x128x128xf32>
      tpu.vector_store %arg4[%c0_10, %c0_11, %c0_12], %12 {strides = array<i32>} : memref<4x128x128xf32, #tpu.memory_space<vmem>>, vector<4x128x128xf32>,
    } else {
    }
    %c2_i32 = arith.constant 2 : i32
    %8 = arith.cmpi eq, %arg1, %c2_i32 : i32
    %9 = arith.extui %8 : i1 to i32
    %c0_i32_6 = arith.constant 0 : i32
    %10 = arith.cmpi ne, %9, %c0_i32_6 : i32
    scf.if %10 {
      %c0_7 = arith.constant 0 : index
      %c0_8 = arith.constant 0 : index
      %c0_9 = arith.constant 0 : index
      %11 = vector.load %arg4[%c0_7, %c0_8, %c0_9] : memref<4x128x128xf32, #tpu.memory_space<vmem>>, vector<4x128x128xf32>
      %c0_10 = arith.constant 0 : index
      %c0_11 = arith.constant 0 : index
      %c0_12 = arith.constant 0 : index
      %12 = vector.load %arg3[%c0_10, %c0_11, %c0_12] : memref<4x128x128xf32, #tpu.memory_space<vmem>>, vector<4x128x128xf32>
      tpu.vector_store %arg3[%c0_10, %c0_11, %c0_12], %11 {strides = array<i32>} : memref<4x128x128xf32, #tpu.memory_space<vmem>>, vector<4x128x128xf32>,
    } else {
    }
    return
  }
  func.func @transform_0(%arg0: i32, %arg1: i32) -> (i32, i32, i32, i32) {
    %c0_i32 = arith.constant 0 : i32
    %c0_i32_0 = arith.constant 0 : i32
    %c0_i32_1 = arith.constant 0 : i32
    return %arg1, %arg0, %c0_i32, %c0_i32_0 : i32, i32, i32, i32
  }
  func.func @transform_1(%arg0: i32, %arg1: i32) -> (i32, i32, i32) {
    %c0_i32 = arith.constant 0 : i32
    %c0_i32_0 = arith.constant 0 : i32
    %c0_i32_1 = arith.constant 0 : i32
    return %arg0, %c0_i32, %c0_i32_0 : i32, i32, i32
  }
}

</mosaic_0001>

<bundles_post_ra>
// kernel: tpu_custom_call.1
= control target key start
LH: loop header
LB: loop body
LE: loop exit
PB: predicated region body
PF: predicated region fallthrough
CT: control target
= control target key end

     0   :  { %6 = vsyncpa [#allocation4], 0  ;;  %s2364_s0 = inlined_call_operand.hbm [shape: f32[3,4,128,128], index: 0, kind: input, shape index: {}]   ;;  %s2365_s1 = inlined_call_operand.hbm [shape: f32[4,128,128], index: 1, kind: output, shape index: {}]  }
   0x1   :  { %8 = vsyncpa [#allocation4 + $0x1], 0 }
   0x2   :  { %9 = vsyncpa [#allocation5], 0  ;;  %s1890_s6 = smov 0   ;;  %s1892_s7 = smov 0  }
   0x3   :  { %s1894_s8 = smov 0   ;;  %s1896_s9 = smov 0  }
   0x4   :  { %s1898_s10 = smov 0   ;;  %s1900_s11 = smov 0  }
   0x5 LB: > { %s1200_s12 = sadd.s32 4294967295, %s1872_s11   ;;  %s24_s13 = sadd.s32 1, %s1868_s10  ;;  %s1872_s11 = sphi %s1900_s11, %s15_s11   ;;  %s1868_s10 = sphi %s1898_s10, %s2428_s10   ;;  %s1864_s9 = sphi %s1896_s9, %s2427_s9   ;;  %s1860_s8 = sphi %s1894_s8, %s2426_s8   ;;  %s1856_s7 = sphi %s1892_s7, %s2425_s7   ;;  %s1852_s6 = sphi %s1890_s6, %s2424_s6  }
   0x6   : > { %p25_p0 = scmp.ge.s32.totalorder %s24_s13, 3  ;;  %s36_s14 = sadd.s32 1, %s1860_s8 }
   0x7   : > { %p43_p1 = scmp.ne.s32.totalorder %s1860_s8, %s1856_s7  ;;  %p44_p2 = scmp.eq.s32.totalorder %s1872_s11, 0 }
   0x8   : > { %s2430_s13 = smov (%p25_p0, %s24_s13), 0  ;;  %p49_p4 = scmp.ne.s32.totalorder %s1856_s7, %s1852_s6 }
   0x9   : > { %p1926_p3 = por %p44_p2, %p43_p1  ;;  %s31_s16 = ssub.s32 %s1868_s10, %s2430_s13 }
   0xa   : > { %p50_p5 = scmp.eq.s32.totalorder %s1200_s12, 0  ;;  %p34_p6 = scmp.eq.s32.totalorder %s31_s16, 0 }
   0xb   : > { %p1706_p8 = scmp.lt.s32.totalorder %s1872_s11, 3  ;;  %s99_s19 = sand.u32 1, %s1860_s8  }
   0xc   : > { %p1935_p7 = por %p50_p5, %p49_p4  ;;  %s1215_s20 = sshll.u32 %s1868_s10, 13 }
   0xd   : > { %s1941_s18 = scalar_select %p34_p6, %s1860_s8, %s36_s14  }
   0xe   : > { %s1203_s21 = sshll.u32 %s99_s19, 9  ;;  %s1948_s24 = scalar_lea.hbm %s2364_s0, %s1215_s20 }
   0xf   : > { %s103_s25 = scalar_lea.vmem [#allocation3], %s1203_s21  ;;  %p1952_p9 = pnand %p1706_p8, %p1926_p3 }
  0x10   : > { %s113_s26 = sshll.u32 %s103_s25, 4  ;;  %s1958_s28 = scalar_lea.sflag [#allocation4], %s99_s19  ;;  %s1956_s26 = int_to_ptr.vmem [resolvable:$true] %s113_s26 }
  0x11   : > { %s1762_s29 = scalar_lea.hbm %s1948_s24, 8192  ;;  %p1764_p11 = pneg %p1952_p9 }
  0x12   : > { %p1763_p10 = scmp.ne.s32.totalorder %s1948_s24, %s1762_s29  ;;  %s1767_s3 = scalar_lea.hbm %s2364_s0, 24576 }
  0x13   : > { %p1768_p0 = scmp.lt.u32.totalorder %s1948_s24, %s2364_s0  ;;  %p1769_p1 = scmp.lt.u32.totalorder %s1767_s3, %s1762_s29 }
  0x14   : > { %p1765_p12 = pnand %p1764_p11, %p1763_p10  ;;  %p1771_p3 = scmp.lt.u32.totalorder %s1762_s29, %s1948_s24 }
  0x15   : > { %p1770_p2 = por %p1769_p1, %p1768_p0 }
  0x16   : > { %p1766_p13 = pneg %p1765_p12 }
  0x17   : > { %p1772_p4 = por %p1771_p3, %p1770_p2 }
  0x19   : > { %p1773_p5 = pnand %p1772_p4, %p1766_p13 }
  0x1b   : > { %1776 = shalt.err (!%p1773_p5)
}
  0x1c   : > { %s1777_s6 = scalar_lea.vmem %s1956_s26, 8192  ;;  %s1874_s14 = smov [#allocation3]  }
  0x1d   : > { %p1778_p6 = scmp.ne.s32.totalorder %s1956_s26, %s1777_s6  ;;  %s1782_s15 = sshll.u32 %s1874_s14, 4  ;;  %s1783_s15 = int_to_ptr.vmem [resolvable:$false] %s1782_s15 }
  0x1e   : > { %s1784_s16 = scalar_lea.vmem %s1783_s15, 16384  ;;  %p1785_p12 = scmp.lt.s32.totalorder %s1956_s26, %s1783_s15 }
  0x1f   : > { %p1780_p8 = pnand %p1778_p6, %p1764_p11  ;;  %p1786_p0 = scmp.lt.s32.totalorder %s1784_s16, %s1777_s6 }
  0x21   : > { %p1781_p10 = pneg %p1780_p8  ;;  %p1787_p1 = por %p1786_p0, %p1785_p12 }
  0x23   : > { %p1788_p2 = pnand %p1787_p1, %p1781_p10 }
  0x25   : > { %1791 = shalt.err (!%p1788_p2)
}
  0x26   : > { %s1875_s19 = smov 128   ;;  %s1876_s20 = smov 8  }
  0x27   : > { %1705 = dma.hbm_to_vmem [thread:$0]  (!%p1952_p9), %s1948_s24, 8192, %s1956_s26, %s1958_s28, %s1875_s19, %s1875_s19, %s1876_s20  }
  0x28   : > { %p1206_p11 = scmp.ge.s32.totalorder %s1872_s11, 1  ;;  %p121_p13 = scmp.lt.s32.totalorder %s1872_s11, 4 }
  0x2a   : > { %p122_p3 = pnand %p1206_p11, %p121_p13 }
  0x2c   : > { %125 = sbr.rel (%p122_p3) target bundleno = 481 (0x1e1), region = 24 }
  0x33   : > { %s127_s21 = sand.u32 1, %s1856_s7  }
  0x34   : > { %s1207_s22 = sshll.u32 %s127_s21, 9  ;;  %s128_s23 = scalar_lea.sflag [#allocation4], %s127_s21 }
  0x35   : > { %s1989_s25 = scalar_lea.vmem [#allocation3], %s1207_s22 }
  0x36   : > { %1843 = dma.done.wait (%p1935_p7), %s128_s23, 8192  }
  0x37   : > { %1845 = vsyncadd (%p1935_p7), %s128_s23, 4294959104  ;;  %v1996_v0 = vld [vmem:[%s1989_s25] sm:$0xff]  ;;  %v1999_v1 = vld [vmem:[%s1989_s25 + $0x8] sm:$0xff]  ;;  %p1208_p7 = scmp.ne.s32.totalorder %s1864_s9, 0 }
  0x38   : > { %v2002_v2 = vld [vmem:[%s1989_s25 + $0x10] sm:$0xff]  ;;  %v2005_v3 = vld [vmem:[%s1989_s25 + $0x18] sm:$0xff]  ;;  %v2008_v4 = vld [vmem:[%s1989_s25 + $0x20] sm:$0xff]  ;;  %215 = vst [vmem:[#allocation2] sm:$0xff] (!%p1208_p7), %v1996_v0 }
  0x39   : > { %v2011_v5 = vld [vmem:[%s1989_s25 + $0x28] sm:$0xff]  ;;  %v2014_v6 = vld [vmem:[%s1989_s25 + $0x30] sm:$0xff]  ;;  %v2017_v7 = vld [vmem:[%s1989_s25 + $0x38] sm:$0xff]  ;;  %216 = vst [vmem:[#allocation2 + $0x8] sm:$0xff] (!%p1208_p7), %v1999_v1 }
  0x3a   : > { %v2020_v8 = vld [vmem:[%s1989_s25 + $0x40] sm:$0xff]  ;;  %v2023_v9 = vld [vmem:[%s1989_s25 + $0x48] sm:$0xff]  ;;  %v2026_v10 = vld [vmem:[%s1989_s25 + $0x50] sm:$0xff]  ;;  %217 = vst [vmem:[#allocation2 + $0x10] sm:$0xff] (!%p1208_p7), %v2002_v2 }
  0x3b   : > { %v2029_v11 = vld [vmem:[%s1989_s25 + $0x58] sm:$0xff]  ;;  %v2032_v12 = vld [vmem:[%s1989_s25 + $0x60] sm:$0xff]  ;;  %v2035_v13 = vld [vmem:[%s1989_s25 + $0x68] sm:$0xff]  ;;  %218 = vst [vmem:[#allocation2 + $0x18] sm:$0xff] (!%p1208_p7), %v2005_v3 }
  0x3c   : > { %v2038_v14 = vld [vmem:[%s1989_s25 + $0x70] sm:$0xff]  ;;  %v2041_v15 = vld [vmem:[%s1989_s25 + $0x78] sm:$0xff]  ;;  %v2044_v16 = vld [vmem:[%s1989_s25 + $0x80] sm:$0xff]  ;;  %219 = vst [vmem:[#allocation2 + $0x20] sm:$0xff] (!%p1208_p7), %v2008_v4 }
  0x3d   : > { %v2047_v17 = vld [vmem:[%s1989_s25 + $0x88] sm:$0xff]  ;;  %v2050_v18 = vld [vmem:[%s1989_s25 + $0x90] sm:$0xff]  ;;  %v2053_v19 = vld [vmem:[%s1989_s25 + $0x98] sm:$0xff]  ;;  %220 = vst [vmem:[#allocation2 + $0x28] sm:$0xff] (!%p1208_p7), %v2011_v5 }
  0x3e   : > { %v2056_v20 = vld [vmem:[%s1989_s25 + $0xa0] sm:$0xff]  ;;  %v2059_v21 = vld [vmem:[%s1989_s25 + $0xa8] sm:$0xff]  ;;  %v2062_v22 = vld [vmem:[%s1989_s25 + $0xb0] sm:$0xff]  ;;  %221 = vst [vmem:[#allocation2 + $0x30] sm:$0xff] (!%p1208_p7), %v2014_v6 }
  0x3f   : > { %v2065_v23 = vld [vmem:[%s1989_s25 + $0xb8] sm:$0xff]  ;;  %v2068_v24 = vld [vmem:[%s1989_s25 + $0xc0] sm:$0xff]  ;;  %v2071_v25 = vld [vmem:[%s1989_s25 + $0xc8] sm:$0xff]  ;;  %222 = vst [vmem:[#allocation2 + $0x38] sm:$0xff] (!%p1208_p7), %v2017_v7 }
  0x40   : > { %v2074_v26 = vld [vmem:[%s1989_s25 + $0xd0] sm:$0xff]  ;;  %v2077_v27 = vld [vmem:[%s1989_s25 + $0xd8] sm:$0xff]  ;;  %v2080_v28 = vld [vmem:[%s1989_s25 + $0xe0] sm:$0xff]  ;;  %223 = vst [vmem:[#allocation2 + $0x40] sm:$0xff] (!%p1208_p7), %v2020_v8 }
  0x41   : > { %v2083_v29 = vld [vmem:[%s1989_s25 + $0xe8] sm:$0xff]  ;;  %v2086_v30 = vld [vmem:[%s1989_s25 + $0xf0] sm:$0xff]  ;;  %v2089_v31 = vld [vmem:[%s1989_s25 + $0xf8] sm:$0xff]  ;;  %224 = vst [vmem:[#allocation2 + $0x48] sm:$0xff] (!%p1208_p7), %v2023_v9 }
  0x42   : > { %v2092_v32 = vld [vmem:[%s1989_s25 + $0x100] sm:$0xff]  ;;  %v2095_v33 = vld [vmem:[%s1989_s25 + $0x108] sm:$0xff]  ;;  %v2098_v34 = vld [vmem:[%s1989_s25 + $0x110] sm:$0xff]  ;;  %225 = vst [vmem:[#allocation2 + $0x50] sm:$0xff] (!%p1208_p7), %v2026_v10 }
  0x43   : > { %v2101_v35 = vld [vmem:[%s1989_s25 + $0x118] sm:$0xff]  ;;  %v2104_v36 = vld [vmem:[%s1989_s25 + $0x120] sm:$0xff]  ;;  %v2107_v37 = vld [vmem:[%s1989_s25 + $0x128] sm:$0xff]  ;;  %226 = vst [vmem:[#allocation2 + $0x58] sm:$0xff] (!%p1208_p7), %v2029_v11 }
  0x44   : > { %v2110_v38 = vld [vmem:[%s1989_s25 + $0x130] sm:$0xff]  ;;  %v2113_v39 = vld [vmem:[%s1989_s25 + $0x138] sm:$0xff]  ;;  %v2116_v40 = vld [vmem:[%s1989_s25 + $0x140] sm:$0xff]  ;;  %227 = vst [vmem:[#allocation2 + $0x60] sm:$0xff] (!%p1208_p7), %v2032_v12 }
  0x45   : > { %2387 = vst [vmem:[#allocation9_spill] sm:$0xff] %v2113_v39  ;;  %2388 = vst [vmem:[#allocation10_spill] sm:$0xff] %v2116_v40  ;;  %v2119_v41 = vld [vmem:[%s1989_s25 + $0x148] sm:$0xff]  ;;  %v2122_v42 = vld [vmem:[%s1989_s25 + $0x150] sm:$0xff] }
  0x46   : > { %2389 = vst [vmem:[#allocation11_spill] sm:$0xff] %v2119_v41  ;;  %2390 = vst [vmem:[#allocation12_spill] sm:$0xff] %v2122_v42  ;;  %v2125_v43 = vld [vmem:[%s1989_s25 + $0x158] sm:$0xff]  ;;  %v2128_v44 = vld [vmem:[%s1989_s25 + $0x160] sm:$0xff] }
  0x47   : > { %2391 = vst [vmem:[#allocation13_spill] sm:$0xff] %v2125_v43  ;;  %2392 = vst [vmem:[#allocation14_spill] sm:$0xff] %v2128_v44  ;;  %v2131_v45 = vld [vmem:[%s1989_s25 + $0x168] sm:$0xff]  ;;  %v2134_v46 = vld [vmem:[%s1989_s25 + $0x170] sm:$0xff] }
  0x48   : > { %2393 = vst [vmem:[#allocation15_spill] sm:$0xff] %v2131_v45  ;;  %2394 = vst [vmem:[#allocation16_spill] sm:$0xff] %v2134_v46  ;;  %v2137_v47 = vld [vmem:[%s1989_s25 + $0x178] sm:$0xff]  ;;  %v2140_v48 = vld [vmem:[%s1989_s25 + $0x180] sm:$0xff] }
  0x49   : > { %2395 = vst [vmem:[#allocation17_spill] sm:$0xff] %v2137_v47  ;;  %v2143_v49 = vld [vmem:[%s1989_s25 + $0x188] sm:$0xff]  ;;  %v2146_v50 = vld [vmem:[%s1989_s25 + $0x190] sm:$0xff]  ;;  %v2149_v51 = vld [vmem:[%s1989_s25 + $0x198] sm:$0xff] }
  0x4a   : > { %v2152_v52 = vld [vmem:[%s1989_s25 + $0x1a0] sm:$0xff]  ;;  %v2155_v53 = vld [vmem:[%s1989_s25 + $0x1a8] sm:$0xff]  ;;  %v2158_v54 = vld [vmem:[%s1989_s25 + $0x1b0] sm:$0xff]  ;;  %214 = sbr.rel (%p1208_p7) target bundleno = 105 (0x69), region = 32  ;;  %228 = vst [vmem:[#allocation2 + $0x68] sm:$0xff] (!%p1208_p7), %v2035_v13 }
  0x4b   : > { %v2161_v55 = vld [vmem:[%s1989_s25 + $0x1b8] sm:$0xff]  ;;  %v2164_v56 = vld [vmem:[%s1989_s25 + $0x1c0] sm:$0xff]  ;;  %v2167_v57 = vld [vmem:[%s1989_s25 + $0x1c8] sm:$0xff]  ;;  %229 = vst [vmem:[#allocation2 + $0x70] sm:$0xff] (!%p1208_p7), %v2038_v14 }
  0x4c   : > { %2396 = vst [vmem:[#allocation18_spill] sm:$0xff] %v2161_v55  ;;  %2397 = vst [vmem:[#allocation19_spill] sm:$0xff] %v2164_v56  ;;  %v2170_v58 = vld [vmem:[%s1989_s25 + $0x1d0] sm:$0xff]  ;;  %v2173_v59 = vld [vmem:[%s1989_s25 + $0x1d8] sm:$0xff] }
  0x4d   : > { %2398 = vst [vmem:[#allocation20_spill] sm:$0xff] %v2167_v57  ;;  %2399 = vst [vmem:[#allocation21_spill] sm:$0xff] %v2170_v58  ;;  %v2176_v60 = vld [vmem:[%s1989_s25 + $0x1e0] sm:$0xff]  ;;  %v2179_v61 = vld [vmem:[%s1989_s25 + $0x1e8] sm:$0xff] }
  0x4e   : > { %2400 = vst [vmem:[#allocation22_spill] sm:$0xff] %v2173_v59  ;;  %2401 = vst [vmem:[#allocation23_spill] sm:$0xff] %v2176_v60  ;;  %v2182_v62 = vld [vmem:[%s1989_s25 + $0x1f0] sm:$0xff]  ;;  %v2185_v63 = vld [vmem:[%s1989_s25 + $0x1f8] sm:$0xff] }
  0x4f   : > { %2402 = vst [vmem:[#allocation24_spill] sm:$0xff] %v2179_v61  ;;  %2403 = vst [vmem:[#allocation25_spill] sm:$0xff] %v2182_v62 }
  0x50   : > { %2404 = vst [vmem:[#allocation26_spill] sm:$0xff] %v2185_v63  ;;  %230 = vst [vmem:[#allocation2 + $0x78] sm:$0xff] (!%p1208_p7), %v2041_v15 }
  0x51   : > { %231 = vst [vmem:[#allocation2 + $0x80] sm:$0xff] %v2044_v16  ;;  %232 = vst [vmem:[#allocation2 + $0x88] sm:$0xff] %v2047_v17 }
  0x52   : > { %233 = vst [vmem:[#allocation2 + $0x90] sm:$0xff] %v2050_v18  ;;  %234 = vst [vmem:[#allocation2 + $0x98] sm:$0xff] %v2053_v19 }
  0x53   : > { %235 = vst [vmem:[#allocation2 + $0xa0] sm:$0xff] %v2056_v20  ;;  %236 = vst [vmem:[#allocation2 + $0xa8] sm:$0xff] %v2059_v21 }
  0x54   : > { %237 = vst [vmem:[#allocation2 + $0xb0] sm:$0xff] %v2062_v22  ;;  %238 = vst [vmem:[#allocation2 + $0xb8] sm:$0xff] %v2065_v23 }
  0x55   : > { %239 = vst [vmem:[#allocation2 + $0xc0] sm:$0xff] %v2068_v24  ;;  %240 = vst [vmem:[#allocation2 + $0xc8] sm:$0xff] %v2071_v25 }
  0x56   : > { %241 = vst [vmem:[#allocation2 + $0xd0] sm:$0xff] %v2074_v26  ;;  %242 = vst [vmem:[#allocation2 + $0xd8] sm:$0xff] %v2077_v27 }
  0x57   : > { %243 = vst [vmem:[#allocation2 + $0xe0] sm:$0xff] %v2080_v28  ;;  %244 = vst [vmem:[#allocation2 + $0xe8] sm:$0xff] %v2083_v29 }
  0x58   : > { %245 = vst [vmem:[#allocation2 + $0xf0] sm:$0xff] %v2086_v30  ;;  %246 = vst [vmem:[#allocation2 + $0xf8] sm:$0xff] %v2089_v31 }
  0x59   : > { %247 = vst [vmem:[#allocation2 + $0x100] sm:$0xff] %v2092_v32  ;;  %248 = vst [vmem:[#allocation2 + $0x108] sm:$0xff] %v2095_v33 }
  0x5a   : > { %249 = vst [vmem:[#allocation2 + $0x110] sm:$0xff] %v2098_v34  ;;  %250 = vst [vmem:[#allocation2 + $0x118] sm:$0xff] %v2101_v35 }
  0x5b   : > { %251 = vst [vmem:[#allocation2 + $0x120] sm:$0xff] %v2104_v36  ;;  %252 = vst [vmem:[#allocation2 + $0x128] sm:$0xff] %v2107_v37 }
  0x5c   : > { %253 = vst [vmem:[#allocation2 + $0x130] sm:$0xff] %v2110_v38  ;;  %254 = vst [vmem:[#allocation2 + $0x138] sm:$0xff] %v2113_v39 }
  0x5d   : > { %255 = vst [vmem:[#allocation2 + $0x140] sm:$0xff] %v2116_v40  ;;  %256 = vst [vmem:[#allocation2 + $0x148] sm:$0xff] %v2119_v41 }
  0x5e   : > { %257 = vst [vmem:[#allocation2 + $0x150] sm:$0xff] %v2122_v42  ;;  %258 = vst [vmem:[#allocation2 + $0x158] sm:$0xff] %v2125_v43 }
  0x5f   : > { %259 = vst [vmem:[#allocation2 + $0x160] sm:$0xff] %v2128_v44  ;;  %260 = vst [vmem:[#allocation2 + $0x168] sm:$0xff] %v2131_v45 }
  0x60   : > { %261 = vst [vmem:[#allocation2 + $0x170] sm:$0xff] %v2134_v46  ;;  %262 = vst [vmem:[#allocation2 + $0x178] sm:$0xff] %v2137_v47 }
  0x61   : > { %263 = vst [vmem:[#allocation2 + $0x180] sm:$0xff] %v2140_v48  ;;  %264 = vst [vmem:[#allocation2 + $0x188] sm:$0xff] %v2143_v49 }
  0x62   : > { %265 = vst [vmem:[#allocation2 + $0x190] sm:$0xff] %v2146_v50  ;;  %266 = vst [vmem:[#allocation2 + $0x198] sm:$0xff] %v2149_v51 }
  0x63   : > { %267 = vst [vmem:[#allocation2 + $0x1a0] sm:$0xff] %v2152_v52  ;;  %268 = vst [vmem:[#allocation2 + $0x1a8] sm:$0xff] %v2155_v53 }
  0x64   : > { %269 = vst [vmem:[#allocation2 + $0x1b0] sm:$0xff] %v2158_v54  ;;  %270 = vst [vmem:[#allocation2 + $0x1b8] sm:$0xff] %v2161_v55 }
  0x65   : > { %271 = vst [vmem:[#allocation2 + $0x1c0] sm:$0xff] %v2164_v56  ;;  %272 = vst [vmem:[#allocation2 + $0x1c8] sm:$0xff] %v2167_v57 }
  0x66   : > { %273 = vst [vmem:[#allocation2 + $0x1d0] sm:$0xff] %v2170_v58  ;;  %274 = vst [vmem:[#allocation2 + $0x1d8] sm:$0xff] %v2173_v59 }
  0x67   : > { %275 = vst [vmem:[#allocation2 + $0x1e0] sm:$0xff] %v2176_v60  ;;  %276 = vst [vmem:[#allocation2 + $0x1e8] sm:$0xff] %v2179_v61 }
  0x68   : > { %277 = vst [vmem:[#allocation2 + $0x1f0] sm:$0xff] %v2182_v62  ;;  %278 = vst [vmem:[#allocation2 + $0x1f8] sm:$0xff] %v2185_v63 }
  0x69 PF: > { %p1209_p9 = scmp.le.s32.totalorder %s1864_s9, 0 }
  0x6a   : > { %v283_v47 = vld [vmem:[#allocation2] sm:$0xff] (!%p1209_p9)  ;;  %v284_v46 = vld [vmem:[#allocation2 + $0x8] sm:$0xff] (!%p1209_p9)  ;;  %1376 = vmatprep.mubr.f32.mxu0 (!%p1209_p9), %v1996_v0  ;;  %1432 = vmatprep.mubr.f32.mxu1 (!%p1209_p9), %v2044_v16  ;;  %v285_v60 = vld [vmem:[#allocation2 + $0x10] sm:$0xff] (!%p1209_p9) }
  0x6b   : > { %282 = sbr.rel (%p1209_p9) target bundleno = 421 (0x1a5), region = 36  ;;  %v1568_v44 = vpack.c.bf16 (!%p1209_p9), %v284_v46, %v283_v47  ;;  %v286_v43 = vld [vmem:[#allocation2 + $0x18] sm:$0xff] (!%p1209_p9)  ;;  %v301_v62 = vld [vmem:[#allocation2 + $0x90] sm:$0xff] (!%p1209_p9)  ;;  %v287_v63 = vld [vmem:[#allocation2 + $0x20] sm:$0xff] (!%p1209_p9) }
  0x6c   : > { %v1572_v58 = vpack.c.bf16 (!%p1209_p9), %v286_v43, %v285_v60  ;;  %v302_v42 = vld [vmem:[#allocation2 + $0x98] sm:$0xff] (!%p1209_p9)  ;;  %v288_v41 = vld [vmem:[#allocation2 + $0x28] sm:$0xff] (!%p1209_p9)  ;;  %v303_v56 = vld [vmem:[#allocation2 + $0xa0] sm:$0xff] (!%p1209_p9) }
  0x6d   : > { %1569 = vmatprep.subr.bf16.mxu0 (!%p1209_p9), %v1568_v44  ;;  %v1604_v57 = vpack.c.bf16 (!%p1209_p9), %v302_v42, %v301_v62  ;;  %v304_v40 = vld [vmem:[#allocation2 + $0xa8] sm:$0xff] (!%p1209_p9)  ;;  %v1576_v0 = vpack.c.bf16 (!%p1209_p9), %v288_v41, %v287_v63  ;;  %v289_v46 = vld [vmem:[#allocation2 + $0x30] sm:$0xff] (!%p1209_p9)  ;;  %v290_v47 = vld [vmem:[#allocation2 + $0x38] sm:$0xff] (!%p1209_p9) }
  0x6e   : > { %1571 = vmatpush3.bf16.msra.mxu0 (!%p1209_p9), %v1568_v44  ;;  %v1608_v16 = vpack.c.bf16 (!%p1209_p9), %v304_v40, %v303_v56  ;;  %v305_v55 = vld [vmem:[#allocation2 + $0xb0] sm:$0xff] (!%p1209_p9)  ;;  %v1580_v43 = vpack.c.bf16 (!%p1209_p9), %v290_v47, %v289_v46  ;;  %v292_v60 = vld [vmem:[#allocation2 + $0x48] sm:$0xff] (!%p1209_p9)  ;;  %v307_v62 = vld [vmem:[#allocation2 + $0xc0] sm:$0xff] (!%p1209_p9) }
  0x6f   : > { %1573 = vmatprep.subr.bf16.mxu0 (!%p1209_p9), %v1572_v58  ;;  %v308_v39 = vld [vmem:[#allocation2 + $0xc8] sm:$0xff] (!%p1209_p9)  ;;  %v293_v44 = vld [vmem:[#allocation2 + $0x50] sm:$0xff] (!%p1209_p9)  ;;  %v294_v56 = vld [vmem:[#allocation2 + $0x58] sm:$0xff] (!%p1209_p9) }
  0x70   : > { %v299_v45 = vld [vmem:[#allocation2 + $0x80] sm:$0xff] (!%p1209_p9)  ;;  %v300_v59 = vld [vmem:[#allocation2 + $0x88] sm:$0xff] (!%p1209_p9)  ;;  %v1616_v40 = vpack.c.bf16 (!%p1209_p9), %v308_v39, %v307_v62  ;;  %v310_v63 = vld [vmem:[#allocation2 + $0xd8] sm:$0xff] (!%p1209_p9) }
  0x71   : > { %v1600_v61 = vpack.c.bf16 (!%p1209_p9), %v300_v59, %v299_v45  ;;  %v306_v45 = vld [vmem:[#allocation2 + $0xb8] sm:$0xff] (!%p1209_p9)  ;;  %v291_v59 = vld [vmem:[#allocation2 + $0x40] sm:$0xff] (!%p1209_p9)  ;;  %v296_v46 = vld [vmem:[#allocation2 + $0x68] sm:$0xff] (!%p1209_p9) }
  0x72   : > { %1575 = vmatpush3.bf16.msra.mxu0 %v1572_v58  ;;  %v1612_v42 = vpack.c.bf16 %v306_v45, %v305_v55  ;;  %v1584_v41 = vpack.c.bf16 %v292_v60, %v291_v59  ;;  %v295_v58 = vld [vmem:[#allocation2 + $0x60] sm:$0xff]  ;;  %v312_v45 = vld [vmem:[#allocation2 + $0xe8] sm:$0xff]  ;;  %v298_v59 = vld [vmem:[#allocation2 + $0x78] sm:$0xff] }
  0x73   : > { %1601 = vmatprep.subr.bf16.mxu1 %v1600_v61  ;;  %1577 = vmatprep.subr.bf16.mxu0 %v1576_v0  ;;  %v311_v47 = vld [vmem:[#allocation2 + $0xe0] sm:$0xff]  ;;  %v313_v60 = vld [vmem:[#allocation2 + $0xf0] sm:$0xff]  ;;  %v314_v62 = vld [vmem:[#allocation2 + $0xf8] sm:$0xff] }
  0x74   : > { %1603 = vmatpush3.bf16.msra.mxu1 %v1600_v61  ;;  %v309_v61 = vld [vmem:[#allocation2 + $0xd0] sm:$0xff]  ;;  %v1624_v39 = vpack.c.bf16 %v312_v45, %v311_v47 }
  0x75   : > { %1605 = vmatprep.subr.bf16.mxu1 %v1604_v57  ;;  %v1620_v55 = vpack.c.bf16 %v310_v63, %v309_v61  ;;  %v331_v61 = vld [vmem:[#allocation2 + $0x180] sm:$0xff]  ;;  %v332_v63 = vld [vmem:[#allocation2 + $0x188] sm:$0xff]  ;;  %v333_v47 = vld [vmem:[#allocation2 + $0x190] sm:$0xff] }
  0x76   : > { %1579 = vmatpush3.bf16.msra.mxu0 %v1576_v0  ;;  %v1592_v0 = vpack.c.bf16 %v296_v46, %v295_v58  ;;  %v317_v58 = vld [vmem:[#allocation2 + $0x110] sm:$0xff]  ;;  %v318_v46 = vld [vmem:[#allocation2 + $0x118] sm:$0xff] }
  0x77   : > { %1581 = vmatprep.subr.bf16.mxu0 %v1580_v43 }
  0x78   : > { %1607 = vmatpush3.bf16.msra.mxu1 %v1604_v57  ;;  %v1588_v57 = vpack.c.bf16 %v294_v56, %v293_v44  ;;  %v315_v44 = vld [vmem:[#allocation2 + $0x100] sm:$0xff]  ;;  %v316_v56 = vld [vmem:[#allocation2 + $0x108] sm:$0xff] }
  0x79   : > { %1609 = vmatprep.subr.bf16.mxu1 %v1608_v16 }
  0x7a   : > { %1583 = vmatpush3.bf16.msra.mxu0 %v1580_v43 }
  0x7b   : > { %1585 = vmatprep.subr.bf16.mxu0 %v1584_v41 }
  0x7c   : > { %1611 = vmatpush3.bf16.msra.mxu1 %v1608_v16  ;;  %v297_v16 = vld [vmem:[#allocation2 + $0x70] sm:$0xff] }
  0x7d   : > { %1613 = vmatprep.subr.bf16.mxu1 %v1612_v42  ;;  %v1596_v43 = vpack.c.bf16 %v298_v59, %v297_v16  ;;  %v319_v16 = vld [vmem:[#allocation2 + $0x120] sm:$0xff]  ;;  %v320_v59 = vld [vmem:[#allocation2 + $0x128] sm:$0xff] }
  0x7e   : > { %1587 = vmatpush3.bf16.msra.mxu0 %v1584_v41  ;;  %v1632_v41 = vpack.c.bf16 %v316_v56, %v315_v44  ;;  %v324_v44 = vld [vmem:[#allocation2 + $0x148] sm:$0xff] }
  0x7f   : > { %1589 = vmatprep.subr.bf16.mxu0 %v1588_v57  ;;  %v340_v56 = vld [vmem:[#allocation2 + $0x1c8] sm:$0xff] }
  0x80   : > { %1615 = vmatpush3.bf16.msra.mxu1 %v1612_v42  ;;  %v1628_v42 = vpack.c.bf16 %v314_v62, %v313_v60  ;;  %v1640_v60 = vpack.c.bf16 %v320_v59, %v319_v16 }
  0x81   : > { %1617 = vmatprep.subr.bf16.mxu1 %v1616_v40 }
  0x82   : > { %1591 = vmatpush3.bf16.msra.mxu0 %v1588_v57  ;;  %v334_v57 = vld [vmem:[#allocation2 + $0x198] sm:$0xff] }
  0x83   : > { %1593 = vmatprep.subr.bf16.mxu0 %v1592_v0  ;;  %v1668_v45 = vpack.c.bf16 %v334_v57, %v333_v47 }
  0x84   : > { %1619 = vmatpush3.bf16.msra.mxu1 %v1616_v40  ;;  %v1664_v40 = vpack.c.bf16 %v332_v63, %v331_v61  ;;  %v326_v61 = vld [vmem:[#allocation2 + $0x158] sm:$0xff] }
  0x85   : > { %1621 = vmatprep.subr.bf16.mxu1 %v1620_v55  ;;  %v342_v63 = vld [vmem:[#allocation2 + $0x1d8] sm:$0xff] }
  0x86   : > { %1595 = vmatpush3.bf16.msra.mxu0 %v1592_v0  ;;  %v335_v0 = vld [vmem:[#allocation2 + $0x1a0] sm:$0xff] }
  0x87   : > { %1597 = vmatprep.subr.bf16.mxu0 %v1596_v43 }
  0x88   : > { %1623 = vmatpush3.bf16.msra.mxu1 %v1620_v55  ;;  %v1636_v55 = vpack.c.bf16 %v318_v46, %v317_v58  ;;  %v330_v58 = vld [vmem:[#allocation2 + $0x178] sm:$0xff] }
  0x89   : > { %1625 = vmatprep.subr.bf16.mxu1 %v1624_v39  ;;  %v346_v46 = vld [vmem:[#allocation2 + $0x1f8] sm:$0xff] }
  0x8a   : > { %1599 = vmatpush3.bf16.msra.mxu0 %v1596_v43  ;;  %v322_v43 = vld [vmem:[#allocation2 + $0x138] sm:$0xff] }
  0x8b   : > { %1633 = vmatprep.subr.bf16.mxu0 %v1632_v41 }
  0x8c   : > { %1627 = vmatpush3.bf16.msra.mxu1 %v1624_v39  ;;  %v336_v39 = vld [vmem:[#allocation2 + $0x1a8] sm:$0xff] }
  0x8d   : > { %1629 = vmatprep.subr.bf16.mxu1 %v1628_v42  ;;  %1377 = vmatmul.mubr.f32.vlgmr.msra.gmra.mrb[0].mxu0 %v1999_v1  ;;  %v1672_v62 = vpack.c.bf16 %v336_v39, %v335_v0  ;;  %v321_v1 = vld [vmem:[#allocation2 + $0x130] sm:$0xff] }
  0x8e   : > { %1635 = vmatpush3.bf16.msra.mxu0 %v1632_v41  ;;  %1379 = vmatprep.mubr.f32.mxu0 %v2002_v2  ;;  %v1644_v2 = vpack.c.bf16 %v322_v43, %v321_v1  ;;  %v328_v41 = vld [vmem:[#allocation2 + $0x168] sm:$0xff] }
  0x8f   : > { %1637 = vmatprep.subr.bf16.mxu0 %v1636_v55 }
  0x90   : > { %1631 = vmatpush3.bf16.msra.mxu1 %v1628_v42  ;;  %v338_v42 = vld [vmem:[#allocation2 + $0x1b8] sm:$0xff] }
  0x91   : > { %1665 = vmatprep.subr.bf16.mxu1 %v1664_v40  ;;  %1380 = vmatmul.mubr.f32.gmra.mrb[2].mxu0 %v2005_v3 }
  0x92   : > { %1639 = vmatpush3.bf16.msra.mxu0 %v1636_v55  ;;  %1382 = vmatprep.mubr.f32.mxu0 %v2008_v4 }
  0x93   : > { %1433 = vmatmul.mubr.f32.vlgmr.msra.gmra.mrb[0].mxu1 %v2047_v17  ;;  %v337_v17 = vld [vmem:[#allocation2 + $0x1b0] sm:$0xff]  ;;  %1641 = vmatprep.subr.bf16.mxu0 %v1640_v60 }
  0x94   : > { %1667 = vmatpush3.bf16.msra.mxu1 %v1664_v40  ;;  %1435 = vmatprep.mubr.f32.mxu1 %v2050_v18  ;;  %v1676_v3 = vpack.c.bf16 %v338_v42, %v337_v17  ;;  %v323_v18 = vld [vmem:[#allocation2 + $0x140] sm:$0xff]  ;;  %v344_v40 = vld [vmem:[#allocation2 + $0x1e8] sm:$0xff] }
  0x95   : > { %1669 = vmatprep.subr.bf16.mxu1 %v1668_v45  ;;  %1383 = vmatmul.mubr.f32.gmra.mrb[4].mxu0 %v2011_v5  ;;  %v1648_v4 = vpack.c.bf16 %v324_v44, %v323_v18 }
  0x96   : > { %1643 = vmatpush3.bf16.msra.mxu0 %v1640_v60  ;;  %1385 = vmatprep.mubr.f32.mxu0 %v2014_v6 }
  0x97   : > { %1436 = vmatmul.mubr.f32.gmra.mrb[2].mxu1 %v2053_v19  ;;  %v339_v19 = vld [vmem:[#allocation2 + $0x1c0] sm:$0xff]  ;;  %1645 = vmatprep.subr.bf16.mxu0 %v1644_v2 }
  0x98   : > { %1671 = vmatpush3.bf16.msra.mxu1 %v1668_v45  ;;  %1438 = vmatprep.mubr.f32.mxu1 %v2056_v20  ;;  %v1680_v5 = vpack.c.bf16 %v340_v56, %v339_v19  ;;  %v325_v20 = vld [vmem:[#allocation2 + $0x150] sm:$0xff] }
  0x99   : > { %1673 = vmatprep.subr.bf16.mxu1 %v1672_v62  ;;  %1386 = vmatmul.mubr.f32.gmra.mrb[6].mxu0 %v2017_v7  ;;  %v1652_v6 = vpack.c.bf16 %v326_v61, %v325_v20 }
  0x9a   : > { %1647 = vmatpush3.bf16.msra.mxu0 %v1644_v2  ;;  %1388 = vmatprep.mubr.f32.mxu0 %v2020_v8 }
  0x9b   : > { %1439 = vmatmul.mubr.f32.gmra.mrb[4].mxu1 %v2059_v21  ;;  %v341_v21 = vld [vmem:[#allocation2 + $0x1d0] sm:$0xff]  ;;  %1649 = vmatprep.subr.bf16.mxu0 %v1648_v4 }
  0x9c   : > { %1675 = vmatpush3.bf16.msra.mxu1 %v1672_v62  ;;  %1441 = vmatprep.mubr.f32.mxu1 %v2062_v22  ;;  %v1684_v7 = vpack.c.bf16 %v342_v63, %v341_v21  ;;  %v327_v22 = vld [vmem:[#allocation2 + $0x160] sm:$0xff] }
  0x9d   : > { %1677 = vmatprep.subr.bf16.mxu1 %v1676_v3  ;;  %1389 = vmatmul.mubr.f32.gmra.mrb[8].mxu0 %v2023_v9  ;;  %v1656_v8 = vpack.c.bf16 %v328_v41, %v327_v22 }
  0x9e   : > { %1651 = vmatpush3.bf16.msra.mxu0 %v1648_v4  ;;  %1391 = vmatprep.mubr.f32.mxu0 %v2026_v10 }
  0x9f   : > { %1442 = vmatmul.mubr.f32.gmra.mrb[6].mxu1 %v2065_v23  ;;  %v343_v23 = vld [vmem:[#allocation2 + $0x1e0] sm:$0xff]  ;;  %1653 = vmatprep.subr.bf16.mxu0 %v1652_v6 }
  0xa0   : > { %1679 = vmatpush3.bf16.msra.mxu1 %v1676_v3  ;;  %1444 = vmatprep.mubr.f32.mxu1 %v2068_v24  ;;  %v1688_v9 = vpack.c.bf16 %v344_v40, %v343_v23  ;;  %v329_v24 = vld [vmem:[#allocation2 + $0x170] sm:$0xff] }
  0xa1   : > { %1681 = vmatprep.subr.bf16.mxu1 %v1680_v5  ;;  %1392 = vmatmul.mubr.f32.gmra.mrb[10].mxu0 %v2029_v11  ;;  %v1660_v10 = vpack.c.bf16 %v330_v58, %v329_v24 }
  0xa2   : > { %1655 = vmatpush3.bf16.msra.mxu0 %v1652_v6  ;;  %1394 = vmatprep.mubr.f32.mxu0 %v2032_v12  ;;  %v2405_v12 = vld [vmem:[#allocation9_spill] sm:$0xff] }
  0xa3   : > { %1445 = vmatmul.mubr.f32.gmra.mrb[8].mxu1 %v2071_v25  ;;  %v345_v25 = vld [vmem:[#allocation2 + $0x1f0] sm:$0xff]  ;;  %1657 = vmatprep.subr.bf16.mxu0 %v1656_v8 }
  0xa4   : > { %1683 = vmatpush3.bf16.msra.mxu1 %v1680_v5  ;;  %1447 = vmatprep.mubr.f32.mxu1 %v2074_v26  ;;  %v1692_v11 = vpack.c.bf16 %v346_v46, %v345_v25  ;;  %v2409_v26 = vld [vmem:[#allocation11_spill] sm:$0xff] }
  0xa5   : > { %1685 = vmatprep.subr.bf16.mxu1 %v1684_v7  ;;  %1395 = vmatmul.mubr.f32.gmra.mrb[12].mxu0 %v2035_v13  ;;  %v2406_v13 = vld [vmem:[#allocation18_spill] sm:$0xff] }
  0xa6   : > { %1659 = vmatpush3.bf16.msra.mxu0 %v1656_v8  ;;  %1397 = vmatprep.mubr.f32.mxu0 %v2038_v14  ;;  %v2407_v14 = vld [vmem:[#allocation10_spill] sm:$0xff] }
  0xa7   : > { %1448 = vmatmul.mubr.f32.gmra.mrb[10].mxu1 %v2077_v27  ;;  %1661 = vmatprep.subr.bf16.mxu0 %v1660_v10  ;;  %v2410_v27 = vld [vmem:[#allocation20_spill] sm:$0xff] }
  0xa8   : > { %1687 = vmatpush3.bf16.msra.mxu1 %v1684_v7  ;;  %1450 = vmatprep.mubr.f32.mxu1 %v2080_v28  ;;  %v2411_v28 = vld [vmem:[#allocation12_spill] sm:$0xff] }
  0xa9   : > { %1689 = vmatprep.subr.bf16.mxu1 %v1688_v9  ;;  %1398 = vmatmul.mubr.f32.gmra.mrb[14].mxu0 %v2041_v15  ;;  %v2408_v15 = vld [vmem:[#allocation19_spill] sm:$0xff] }
  0xaa   : > { %1663 = vmatpush3.bf16.msra.mxu0 %v1660_v10  ;;  %1488 = vmatprep.mubr.f32.mxu0 %v2092_v32  ;;  %v2415_v32 = vld [vmem:[#allocation14_spill] sm:$0xff] }
  0xab   : > { %1451 = vmatmul.mubr.f32.gmra.mrb[12].mxu1 %v2083_v29  ;;  %v2412_v29 = vld [vmem:[#allocation21_spill] sm:$0xff] }
  0xac   : > { %1691 = vmatpush3.bf16.msra.mxu1 %v1688_v9  ;;  %1453 = vmatprep.mubr.f32.mxu1 %v2086_v30  ;;  %v2413_v30 = vld [vmem:[#allocation13_spill] sm:$0xff] }
  0xad   : > { %1693 = vmatprep.subr.bf16.mxu1 %v1692_v11  ;;  %1489 = vmatmul.mubr.f32.vlgmr.msra.gmra.mrb[16].mxu0 %v2095_v33  ;;  %v2416_v33 = vld [vmem:[#allocation23_spill] sm:$0xff] }
  0xae   : > { %1491 = vmatprep.mubr.f32.mxu0 %v2098_v34  ;;  %v2417_v34 = vld [vmem:[#allocation15_spill] sm:$0xff] }
  0xaf   : > { %1454 = vmatmul.mubr.f32.gmra.mrb[14].mxu1 %v2089_v31  ;;  %v2414_v31 = vld [vmem:[#allocation22_spill] sm:$0xff] }
  0xb0   : > { %1695 = vmatpush3.bf16.msra.mxu1 %v1692_v11  ;;  %1544 = vmatprep.mubr.f32.mxu1 %v2140_v48  ;;  %v2422_v48 = vld [vmem:[#allocation26_spill] sm:$0xff] }
  0xb1   : > { %1492 = vmatmul.mubr.f32.gmra.mrb[18].mxu0 %v2101_v35  ;;  %v2418_v35 = vld [vmem:[#allocation24_spill] sm:$0xff] }
  0xb2   : > { %1494 = vmatprep.mubr.f32.mxu0 %v2104_v36  ;;  %v2419_v36 = vld [vmem:[#allocation16_spill] sm:$0xff] }
  0xb3   : > { %1545 = vmatmul.mubr.f32.vlgmr.msra.gmra.mrb[16].mxu1 %v2143_v49 }
  0xb4   : > { %1547 = vmatprep.mubr.f32.mxu1 %v2146_v50 }
  0xb5   : > { %1495 = vmatmul.mubr.f32.gmra.mrb[20].mxu0 %v2107_v37  ;;  %v2420_v37 = vld [vmem:[#allocation25_spill] sm:$0xff] }
  0xb6   : > { %1497 = vmatprep.mubr.f32.mxu0 %v2110_v38  ;;  %v2421_v38 = vld [vmem:[#allocation17_spill] sm:$0xff] }
  0xb7   : > { %1548 = vmatmul.mubr.f32.gmra.mrb[18].mxu1 %v2149_v51 }
  0xb8   : > { %1550 = vmatprep.mubr.f32.mxu1 %v2152_v52 }
  0xb9   : > { %1498 = vmatmul.mubr.f32.gmra.mrb[22].mxu0 %v2405_v12 }
  0xba   : > { %1500 = vmatprep.mubr.f32.mxu0 %v2407_v14 }
  0xbb   : > { %1551 = vmatmul.mubr.f32.gmra.mrb[20].mxu1 %v2155_v53 }
  0xbc   : > { %1553 = vmatprep.mubr.f32.mxu1 %v2158_v54 }
  0xbd   : > { %1501 = vmatmul.mubr.f32.gmra.mrb[24].mxu0 %v2409_v26 }
  0xbe   : > { %1503 = vmatprep.mubr.f32.mxu0 %v2411_v28 }
  0xbf   : > { %1554 = vmatmul.mubr.f32.gmra.mrb[22].mxu1 %v2406_v13 }
  0xc0   : > { %1556 = vmatprep.mubr.f32.mxu1 %v2408_v15 }
  0xc1   : > { %1504 = vmatmul.mubr.f32.gmra.mrb[26].mxu0 %v2413_v30 }
  0xc2   : > { %1506 = vmatprep.mubr.f32.mxu0 %v2415_v32 }
  0xc3   : > { %1557 = vmatmul.mubr.f32.gmra.mrb[24].mxu1 %v2410_v27 }
  0xc4   : > { %1559 = vmatprep.mubr.f32.mxu1 %v2412_v29 }
  0xc5   : > { %1507 = vmatmul.mubr.f32.gmra.mrb[28].mxu0 %v2417_v34 }
  0xc6   : > { %1509 = vmatprep.mubr.f32.mxu0 %v2419_v36 }
  0xc7   : > { %1560 = vmatmul.mubr.f32.gmra.mrb[26].mxu1 %v2414_v31 }
  0xc8   : > { %1562 = vmatprep.mubr.f32.mxu1 %v2416_v33 }
  0xc9   : > { %1510 = vmatmul.mubr.f32.gmra.mrb[30].mxu0 %v2421_v38 }
  0xcb   : > { %1563 = vmatmul.mubr.f32.gmra.mrb[28].mxu1 %v2418_v35 }
  0xcc   : > { %1565 = vmatprep.mubr.f32.mxu1 %v2420_v37 }
  0xcf   : > { %1566 = vmatmul.mubr.f32.gmra.mrb[30].mxu1 %v2422_v48 }
 0x160   : > { %v1378_v49 = vpop.f32.mrb[0].mxu0 }
 0x161   : > { %928 = vst [vmem:[#allocation2 + $0x8] sm:$0xff] %v1378_v49  ;;  %v413_v51 = vpop.f32.mrb[1].mxu0 }
 0x162   : > { %927 = vst [vmem:[#allocation2] sm:$0xff] %v413_v51 }
 0x164   : > { %v1381_v53 = vpop.f32.mrb[2].mxu0 }
 0x165   : > { %930 = vst [vmem:[#allocation2 + $0x18] sm:$0xff] %v1381_v53  ;;  %v423_v47 = vpop.f32.mrb[3].mxu0 }
 0x166   : > { %v1434_v50 = vpop.f32.mrb[0].mxu1  ;;  %929 = vst [vmem:[#allocation2 + $0x10] sm:$0xff] %v423_v47 }
 0x167   : > { %944 = vst [vmem:[#allocation2 + $0x88] sm:$0xff] %v1434_v50  ;;  %v558_v52 = vpop.f32.mrb[1].mxu1 }
 0x168   : > { %943 = vst [vmem:[#allocation2 + $0x80] sm:$0xff] %v558_v52  ;;  %v1384_v55 = vpop.f32.mrb[4].mxu0 }
 0x169   : > { %932 = vst [vmem:[#allocation2 + $0x28] sm:$0xff] %v1384_v55  ;;  %v433_v16 = vpop.f32.mrb[5].mxu0 }
 0x16a   : > { %v1437_v54 = vpop.f32.mrb[2].mxu1  ;;  %931 = vst [vmem:[#allocation2 + $0x20] sm:$0xff] %v433_v16 }
 0x16b   : > { %946 = vst [vmem:[#allocation2 + $0x98] sm:$0xff] %v1437_v54  ;;  %v568_v57 = vpop.f32.mrb[3].mxu1 }
 0x16c   : > { %945 = vst [vmem:[#allocation2 + $0x90] sm:$0xff] %v568_v57  ;;  %v1387_v0 = vpop.f32.mrb[6].mxu0 }
 0x16d   : > { %934 = vst [vmem:[#allocation2 + $0x38] sm:$0xff] %v1387_v0  ;;  %v443_v60 = vpop.f32.mrb[7].mxu0 }
 0x16e   : > { %v1440_v45 = vpop.f32.mrb[4].mxu1  ;;  %933 = vst [vmem:[#allocation2 + $0x30] sm:$0xff] %v443_v60 }
 0x16f   : > { %948 = vst [vmem:[#allocation2 + $0xa8] sm:$0xff] %v1440_v45  ;;  %v578_v59 = vpop.f32.mrb[5].mxu1 }
 0x170   : > { %947 = vst [vmem:[#allocation2 + $0xa0] sm:$0xff] %v578_v59  ;;  %v1390_v1 = vpop.f32.mrb[8].mxu0 }
 0x171   : > { %936 = vst [vmem:[#allocation2 + $0x48] sm:$0xff] %v1390_v1  ;;  %v453_v17 = vpop.f32.mrb[9].mxu0 }
 0x172   : > { %v1443_v39 = vpop.f32.mrb[6].mxu1  ;;  %935 = vst [vmem:[#allocation2 + $0x40] sm:$0xff] %v453_v17 }
 0x173   : > { %950 = vst [vmem:[#allocation2 + $0xb8] sm:$0xff] %v1443_v39  ;;  %v588_v62 = vpop.f32.mrb[7].mxu1 }
 0x174   : > { %949 = vst [vmem:[#allocation2 + $0xb0] sm:$0xff] %v588_v62  ;;  %v1393_v2 = vpop.f32.mrb[10].mxu0 }
 0x175   : > { %938 = vst [vmem:[#allocation2 + $0x58] sm:$0xff] %v1393_v2  ;;  %v463_v18 = vpop.f32.mrb[11].mxu0 }
 0x176   : > { %v1446_v43 = vpop.f32.mrb[8].mxu1  ;;  %937 = vst [vmem:[#allocation2 + $0x50] sm:$0xff] %v463_v18 }
 0x177   : > { %952 = vst [vmem:[#allocation2 + $0xc8] sm:$0xff] %v1446_v43  ;;  %v598_v42 = vpop.f32.mrb[9].mxu1 }
 0x178   : > { %951 = vst [vmem:[#allocation2 + $0xc0] sm:$0xff] %v598_v42  ;;  %v1396_v19 = vpop.f32.mrb[12].mxu0 }
 0x179   : > { %940 = vst [vmem:[#allocation2 + $0x68] sm:$0xff] %v1396_v19  ;;  %v473_v4 = vpop.f32.mrb[13].mxu0 }
 0x17a   : > { %v1449_v3 = vpop.f32.mrb[10].mxu1  ;;  %939 = vst [vmem:[#allocation2 + $0x60] sm:$0xff] %v473_v4 }
 0x17b   : > { %954 = vst [vmem:[#allocation2 + $0xd8] sm:$0xff] %v1449_v3  ;;  %v608_v44 = vpop.f32.mrb[11].mxu1 }
 0x17c   : > { %953 = vst [vmem:[#allocation2 + $0xd0] sm:$0xff] %v608_v44  ;;  %v1399_v20 = vpop.f32.mrb[14].mxu0 }
 0x17d   : > { %942 = vst [vmem:[#allocation2 + $0x78] sm:$0xff] %v1399_v20  ;;  %v483_v21 = vpop.f32.mrb[15].mxu0 }
 0x17e   : > { %v1452_v56 = vpop.f32.mrb[12].mxu1  ;;  %941 = vst [vmem:[#allocation2 + $0x70] sm:$0xff] %v483_v21 }
 0x17f   : > { %956 = vst [vmem:[#allocation2 + $0xe8] sm:$0xff] %v1452_v56  ;;  %v618_v5 = vpop.f32.mrb[13].mxu1 }
 0x180   : > { %955 = vst [vmem:[#allocation2 + $0xe0] sm:$0xff] %v618_v5  ;;  %v1490_v6 = vpop.f32.mrb[16].mxu0 }
 0x181   : > { %960 = vst [vmem:[#allocation2 + $0x108] sm:$0xff] %v1490_v6  ;;  %v703_v22 = vpop.f32.mrb[17].mxu0 }
 0x182   : > { %v1455_v61 = vpop.f32.mrb[14].mxu1  ;;  %959 = vst [vmem:[#allocation2 + $0x100] sm:$0xff] %v703_v22 }
 0x183   : > { %958 = vst [vmem:[#allocation2 + $0xf8] sm:$0xff] %v1455_v61  ;;  %v628_v63 = vpop.f32.mrb[15].mxu1 }
 0x184   : > { %957 = vst [vmem:[#allocation2 + $0xf0] sm:$0xff] %v628_v63  ;;  %v1493_v23 = vpop.f32.mrb[18].mxu0 }
 0x185   : > { %962 = vst [vmem:[#allocation2 + $0x118] sm:$0xff] %v1493_v23  ;;  %v713_v8 = vpop.f32.mrb[19].mxu0 }
 0x186   : > { %v1546_v7 = vpop.f32.mrb[16].mxu1  ;;  %961 = vst [vmem:[#allocation2 + $0x110] sm:$0xff] %v713_v8 }
 0x187   : > { %976 = vst [vmem:[#allocation2 + $0x188] sm:$0xff] %v1546_v7  ;;  %v848_v41 = vpop.f32.mrb[17].mxu1 }
 0x188   : > { %975 = vst [vmem:[#allocation2 + $0x180] sm:$0xff] %v848_v41  ;;  %v1496_v24 = vpop.f32.mrb[20].mxu0 }
 0x189   : > { %964 = vst [vmem:[#allocation2 + $0x128] sm:$0xff] %v1496_v24  ;;  %v723_v25 = vpop.f32.mrb[21].mxu0 }
 0x18a   : > { %v1549_v40 = vpop.f32.mrb[18].mxu1  ;;  %963 = vst [vmem:[#allocation2 + $0x120] sm:$0xff] %v723_v25 }
 0x18b   : > { %978 = vst [vmem:[#allocation2 + $0x198] sm:$0xff] %v1549_v40  ;;  %v858_v9 = vpop.f32.mrb[19].mxu1 }
 0x18c   : > { %977 = vst [vmem:[#allocation2 + $0x190] sm:$0xff] %v858_v9  ;;  %v1499_v10 = vpop.f32.mrb[22].mxu0 }
 0x18d   : > { %966 = vst [vmem:[#allocation2 + $0x138] sm:$0xff] %v1499_v10  ;;  %v733_v12 = vpop.f32.mrb[23].mxu0 }
 0x18e   : > { %v1552_v58 = vpop.f32.mrb[20].mxu1  ;;  %965 = vst [vmem:[#allocation2 + $0x130] sm:$0xff] %v733_v12 }
 0x18f   : > { %980 = vst [vmem:[#allocation2 + $0x1a8] sm:$0xff] %v1552_v58  ;;  %v868_v46 = vpop.f32.mrb[21].mxu1 }
 0x190   : > { %979 = vst [vmem:[#allocation2 + $0x1a0] sm:$0xff] %v868_v46  ;;  %v1502_v14 = vpop.f32.mrb[24].mxu0 }
 0x191   : > { %968 = vst [vmem:[#allocation2 + $0x148] sm:$0xff] %v1502_v14  ;;  %v743_v26 = vpop.f32.mrb[25].mxu0 }
 0x192   : > { %v1555_v11 = vpop.f32.mrb[22].mxu1  ;;  %967 = vst [vmem:[#allocation2 + $0x140] sm:$0xff] %v743_v26 }
 0x193   : > { %982 = vst [vmem:[#allocation2 + $0x1b8] sm:$0xff] %v1555_v11  ;;  %v878_v13 = vpop.f32.mrb[23].mxu1 }
 0x194   : > { %981 = vst [vmem:[#allocation2 + $0x1b0] sm:$0xff] %v878_v13  ;;  %v1505_v28 = vpop.f32.mrb[26].mxu0 }
 0x195   : > { %970 = vst [vmem:[#allocation2 + $0x158] sm:$0xff] %v1505_v28  ;;  %v753_v30 = vpop.f32.mrb[27].mxu0 }
 0x196   : > { %v1558_v15 = vpop.f32.mrb[24].mxu1  ;;  %969 = vst [vmem:[#allocation2 + $0x150] sm:$0xff] %v753_v30 }
 0x197   : > { %984 = vst [vmem:[#allocation2 + $0x1c8] sm:$0xff] %v1558_v15  ;;  %v888_v27 = vpop.f32.mrb[25].mxu1 }
 0x198   : > { %983 = vst [vmem:[#allocation2 + $0x1c0] sm:$0xff] %v888_v27  ;;  %v1508_v32 = vpop.f32.mrb[28].mxu0 }
 0x199   : > { %972 = vst [vmem:[#allocation2 + $0x168] sm:$0xff] %v1508_v32  ;;  %v763_v34 = vpop.f32.mrb[29].mxu0 }
 0x19a   : > { %v1561_v29 = vpop.f32.mrb[26].mxu1  ;;  %971 = vst [vmem:[#allocation2 + $0x160] sm:$0xff] %v763_v34 }
 0x19b   : > { %986 = vst [vmem:[#allocation2 + $0x1d8] sm:$0xff] %v1561_v29  ;;  %v898_v31 = vpop.f32.mrb[27].mxu1 }
 0x19c   : > { %985 = vst [vmem:[#allocation2 + $0x1d0] sm:$0xff] %v898_v31  ;;  %v1511_v36 = vpop.f32.mrb[30].mxu0 }
 0x19d   : > { %974 = vst [vmem:[#allocation2 + $0x178] sm:$0xff] %v1511_v36  ;;  %v773_v38 = vpop.f32.mrb[31].mxu0 }
 0x19e   : > { %v1564_v33 = vpop.f32.mrb[28].mxu1  ;;  %973 = vst [vmem:[#allocation2 + $0x170] sm:$0xff] %v773_v38 }
 0x19f   : > { %988 = vst [vmem:[#allocation2 + $0x1e8] sm:$0xff] %v1564_v33  ;;  %v908_v35 = vpop.f32.mrb[29].mxu1 }
 0x1a0   : > { %987 = vst [vmem:[#allocation2 + $0x1e0] sm:$0xff] %v908_v35 }
 0x1a2   : > { %v1567_v37 = vpop.f32.mrb[30].mxu1 }
 0x1a3   : > { %990 = vst [vmem:[#allocation2 + $0x1f8] sm:$0xff] %v1567_v37  ;;  %v918_v48 = vpop.f32.mrb[31].mxu1 }
 0x1a4   : > { %989 = vst [vmem:[#allocation2 + $0x1f0] sm:$0xff] %v918_v48 }
 0x1a5 PF: > { %p1210_p4 = scmp.ne.s32.totalorder %s1864_s9, 2 }
 0x1a6   : > { %v995_v49 = vld [vmem:[#allocation2] sm:$0xff] (!%p1210_p4)  ;;  %v996_v50 = vld [vmem:[#allocation2 + $0x8] sm:$0xff] (!%p1210_p4)  ;;  %v997_v51 = vld [vmem:[#allocation2 + $0x10] sm:$0xff] (!%p1210_p4) }
 0x1a7   : > { %994 = sbr.rel (%p1210_p4) target bundleno = 455 (0x1c7), region = 40  ;;  %1059 = vst [vmem:[#allocation6] sm:$0xff] (!%p1210_p4), %v995_v49  ;;  %1060 = vst [vmem:[#allocation6 + $0x8] sm:$0xff] (!%p1210_p4), %v996_v50  ;;  %v998_v52 = vld [vmem:[#allocation2 + $0x18] sm:$0xff] (!%p1210_p4)  ;;  %v999_v53 = vld [vmem:[#allocation2 + $0x20] sm:$0xff] (!%p1210_p4) }
 0x1a8   : > { %1061 = vst [vmem:[#allocation6 + $0x10] sm:$0xff] (!%p1210_p4), %v997_v51  ;;  %v1000_v54 = vld [vmem:[#allocation2 + $0x28] sm:$0xff] (!%p1210_p4)  ;;  %1062 = vst [vmem:[#allocation6 + $0x18] sm:$0xff] (!%p1210_p4), %v998_v52  ;;  %v1001_v47 = vld [vmem:[#allocation2 + $0x30] sm:$0xff] (!%p1210_p4) }
 0x1a9   : > { %1063 = vst [vmem:[#allocation6 + $0x20] sm:$0xff] (!%p1210_p4), %v999_v53  ;;  %1064 = vst [vmem:[#allocation6 + $0x28] sm:$0xff] (!%p1210_p4), %v1000_v54  ;;  %v1002_v57 = vld [vmem:[#allocation2 + $0x38] sm:$0xff] (!%p1210_p4)  ;;  %v1003_v55 = vld [vmem:[#allocation2 + $0x40] sm:$0xff] (!%p1210_p4) }
 0x1aa   : > { %1065 = vst [vmem:[#allocation6 + $0x30] sm:$0xff] (!%p1210_p4), %v1001_v47  ;;  %1066 = vst [vmem:[#allocation6 + $0x38] sm:$0xff] (!%p1210_p4), %v1002_v57  ;;  %v1004_v45 = vld [vmem:[#allocation2 + $0x48] sm:$0xff] (!%p1210_p4)  ;;  %v1005_v16 = vld [vmem:[#allocation2 + $0x50] sm:$0xff] (!%p1210_p4) }
 0x1ab   : > { %1067 = vst [vmem:[#allocation6 + $0x40] sm:$0xff] (!%p1210_p4), %v1003_v55  ;;  %v1006_v59 = vld [vmem:[#allocation2 + $0x58] sm:$0xff] (!%p1210_p4)  ;;  %1068 = vst [vmem:[#allocation6 + $0x48] sm:$0xff] (!%p1210_p4), %v1004_v45  ;;  %v1007_v0 = vld [vmem:[#allocation2 + $0x60] sm:$0xff] (!%p1210_p4) }
 0x1ac   : > { %1069 = vst [vmem:[#allocation6 + $0x50] sm:$0xff] (!%p1210_p4), %v1005_v16  ;;  %1070 = vst [vmem:[#allocation6 + $0x58] sm:$0xff] (!%p1210_p4), %v1006_v59  ;;  %v1008_v39 = vld [vmem:[#allocation2 + $0x68] sm:$0xff] (!%p1210_p4)  ;;  %v1009_v60 = vld [vmem:[#allocation2 + $0x70] sm:$0xff] (!%p1210_p4) }
 0x1ad   : > { %1071 = vst [vmem:[#allocation6 + $0x60] sm:$0xff] (!%p1210_p4), %v1007_v0  ;;  %1072 = vst [vmem:[#allocation6 + $0x68] sm:$0xff] (!%p1210_p4), %v1008_v39  ;;  %v1010_v62 = vld [vmem:[#allocation2 + $0x78] sm:$0xff] (!%p1210_p4)  ;;  %v1011_v1 = vld [vmem:[#allocation2 + $0x80] sm:$0xff] (!%p1210_p4) }
 0x1ae   : > { %1073 = vst [vmem:[#allocation6 + $0x70] sm:$0xff] %v1009_v60  ;;  %v1012_v43 = vld [vmem:[#allocation2 + $0x88] sm:$0xff]  ;;  %1074 = vst [vmem:[#allocation6 + $0x78] sm:$0xff] %v1010_v62  ;;  %v1013_v17 = vld [vmem:[#allocation2 + $0x90] sm:$0xff] }
 0x1af   : > { %1075 = vst [vmem:[#allocation6 + $0x80] sm:$0xff] %v1011_v1  ;;  %1076 = vst [vmem:[#allocation6 + $0x88] sm:$0xff] %v1012_v43  ;;  %v1014_v42 = vld [vmem:[#allocation2 + $0x98] sm:$0xff]  ;;  %v1015_v2 = vld [vmem:[#allocation2 + $0xa0] sm:$0xff] }
 0x1b0   : > { %1077 = vst [vmem:[#allocation6 + $0x90] sm:$0xff] %v1013_v17  ;;  %1078 = vst [vmem:[#allocation6 + $0x98] sm:$0xff] %v1014_v42  ;;  %v1016_v3 = vld [vmem:[#allocation2 + $0xa8] sm:$0xff]  ;;  %v1017_v18 = vld [vmem:[#allocation2 + $0xb0] sm:$0xff] }
 0x1b1   : > { %1079 = vst [vmem:[#allocation6 + $0xa0] sm:$0xff] %v1015_v2  ;;  %v1018_v44 = vld [vmem:[#allocation2 + $0xb8] sm:$0xff]  ;;  %1080 = vst [vmem:[#allocation6 + $0xa8] sm:$0xff] %v1016_v3  ;;  %v1019_v19 = vld [vmem:[#allocation2 + $0xc0] sm:$0xff] }
 0x1b2   : > { %1081 = vst [vmem:[#allocation6 + $0xb0] sm:$0xff] %v1017_v18  ;;  %1082 = vst [vmem:[#allocation6 + $0xb8] sm:$0xff] %v1018_v44  ;;  %v1020_v56 = vld [vmem:[#allocation2 + $0xc8] sm:$0xff]  ;;  %v1021_v4 = vld [vmem:[#allocation2 + $0xd0] sm:$0xff] }
 0x1b3   : > { %1083 = vst [vmem:[#allocation6 + $0xc0] sm:$0xff] %v1019_v19  ;;  %1084 = vst [vmem:[#allocation6 + $0xc8] sm:$0xff] %v1020_v56  ;;  %v1022_v5 = vld [vmem:[#allocation2 + $0xd8] sm:$0xff]  ;;  %v1023_v20 = vld [vmem:[#allocation2 + $0xe0] sm:$0xff] }
 0x1b4   : > { %1085 = vst [vmem:[#allocation6 + $0xd0] sm:$0xff] %v1021_v4  ;;  %v1024_v61 = vld [vmem:[#allocation2 + $0xe8] sm:$0xff]  ;;  %1086 = vst [vmem:[#allocation6 + $0xd8] sm:$0xff] %v1022_v5  ;;  %v1025_v21 = vld [vmem:[#allocation2 + $0xf0] sm:$0xff] }
 0x1b5   : > { %1087 = vst [vmem:[#allocation6 + $0xe0] sm:$0xff] %v1023_v20  ;;  %1088 = vst [vmem:[#allocation6 + $0xe8] sm:$0xff] %v1024_v61  ;;  %v1026_v63 = vld [vmem:[#allocation2 + $0xf8] sm:$0xff]  ;;  %v1027_v6 = vld [vmem:[#allocation2 + $0x100] sm:$0xff] }
 0x1b6   : > { %1089 = vst [vmem:[#allocation6 + $0xf0] sm:$0xff] %v1025_v21  ;;  %1090 = vst [vmem:[#allocation6 + $0xf8] sm:$0xff] %v1026_v63  ;;  %v1028_v7 = vld [vmem:[#allocation2 + $0x108] sm:$0xff]  ;;  %v1029_v22 = vld [vmem:[#allocation2 + $0x110] sm:$0xff] }
 0x1b7   : > { %1091 = vst [vmem:[#allocation6 + $0x100] sm:$0xff] %v1027_v6  ;;  %v1030_v41 = vld [vmem:[#allocation2 + $0x118] sm:$0xff]  ;;  %1092 = vst [vmem:[#allocation6 + $0x108] sm:$0xff] %v1028_v7  ;;  %v1031_v23 = vld [vmem:[#allocation2 + $0x120] sm:$0xff] }
 0x1b8   : > { %1093 = vst [vmem:[#allocation6 + $0x110] sm:$0xff] %v1029_v22  ;;  %1094 = vst [vmem:[#allocation6 + $0x118] sm:$0xff] %v1030_v41  ;;  %v1032_v40 = vld [vmem:[#allocation2 + $0x128] sm:$0xff]  ;;  %v1033_v8 = vld [vmem:[#allocation2 + $0x130] sm:$0xff] }
 0x1b9   : > { %1095 = vst [vmem:[#allocation6 + $0x120] sm:$0xff] %v1031_v23  ;;  %1096 = vst [vmem:[#allocation6 + $0x128] sm:$0xff] %v1032_v40  ;;  %v1034_v9 = vld [vmem:[#allocation2 + $0x138] sm:$0xff]  ;;  %v1035_v24 = vld [vmem:[#allocation2 + $0x140] sm:$0xff] }
 0x1ba   : > { %1097 = vst [vmem:[#allocation6 + $0x130] sm:$0xff] %v1033_v8  ;;  %v1036_v58 = vld [vmem:[#allocation2 + $0x148] sm:$0xff]  ;;  %1098 = vst [vmem:[#allocation6 + $0x138] sm:$0xff] %v1034_v9  ;;  %v1037_v25 = vld [vmem:[#allocation2 + $0x150] sm:$0xff] }
 0x1bb   : > { %1099 = vst [vmem:[#allocation6 + $0x140] sm:$0xff] %v1035_v24  ;;  %1100 = vst [vmem:[#allocation6 + $0x148] sm:$0xff] %v1036_v58  ;;  %v1038_v46 = vld [vmem:[#allocation2 + $0x158] sm:$0xff]  ;;  %v1039_v10 = vld [vmem:[#allocation2 + $0x160] sm:$0xff] }
 0x1bc   : > { %1101 = vst [vmem:[#allocation6 + $0x150] sm:$0xff] %v1037_v25  ;;  %1102 = vst [vmem:[#allocation6 + $0x158] sm:$0xff] %v1038_v46  ;;  %v1040_v11 = vld [vmem:[#allocation2 + $0x168] sm:$0xff]  ;;  %v1041_v12 = vld [vmem:[#allocation2 + $0x170] sm:$0xff] }
 0x1bd   : > { %1103 = vst [vmem:[#allocation6 + $0x160] sm:$0xff] %v1039_v10  ;;  %v1042_v13 = vld [vmem:[#allocation2 + $0x178] sm:$0xff]  ;;  %1104 = vst [vmem:[#allocation6 + $0x168] sm:$0xff] %v1040_v11  ;;  %v1043_v14 = vld [vmem:[#allocation2 + $0x180] sm:$0xff] }
 0x1be   : > { %1105 = vst [vmem:[#allocation6 + $0x170] sm:$0xff] %v1041_v12  ;;  %1106 = vst [vmem:[#allocation6 + $0x178] sm:$0xff] %v1042_v13  ;;  %v1044_v15 = vld [vmem:[#allocation2 + $0x188] sm:$0xff]  ;;  %v1045_v26 = vld [vmem:[#allocation2 + $0x190] sm:$0xff] }
 0x1bf   : > { %1107 = vst [vmem:[#allocation6 + $0x180] sm:$0xff] %v1043_v14  ;;  %1108 = vst [vmem:[#allocation6 + $0x188] sm:$0xff] %v1044_v15  ;;  %v1046_v27 = vld [vmem:[#allocation2 + $0x198] sm:$0xff]  ;;  %v1047_v28 = vld [vmem:[#allocation2 + $0x1a0] sm:$0xff] }
 0x1c0   : > { %1109 = vst [vmem:[#allocation6 + $0x190] sm:$0xff] %v1045_v26  ;;  %v1048_v29 = vld [vmem:[#allocation2 + $0x1a8] sm:$0xff]  ;;  %1110 = vst [vmem:[#allocation6 + $0x198] sm:$0xff] %v1046_v27  ;;  %v1049_v30 = vld [vmem:[#allocation2 + $0x1b0] sm:$0xff] }
 0x1c1   : > { %1111 = vst [vmem:[#allocation6 + $0x1a0] sm:$0xff] %v1047_v28  ;;  %1112 = vst [vmem:[#allocation6 + $0x1a8] sm:$0xff] %v1048_v29  ;;  %v1050_v31 = vld [vmem:[#allocation2 + $0x1b8] sm:$0xff]  ;;  %v1051_v32 = vld [vmem:[#allocation2 + $0x1c0] sm:$0xff] }
 0x1c2   : > { %1113 = vst [vmem:[#allocation6 + $0x1b0] sm:$0xff] %v1049_v30  ;;  %1114 = vst [vmem:[#allocation6 + $0x1b8] sm:$0xff] %v1050_v31  ;;  %v1052_v33 = vld [vmem:[#allocation2 + $0x1c8] sm:$0xff]  ;;  %v1053_v34 = vld [vmem:[#allocation2 + $0x1d0] sm:$0xff] }
 0x1c3   : > { %1115 = vst [vmem:[#allocation6 + $0x1c0] sm:$0xff] %v1051_v32  ;;  %v1054_v35 = vld [vmem:[#allocation2 + $0x1d8] sm:$0xff]  ;;  %1116 = vst [vmem:[#allocation6 + $0x1c8] sm:$0xff] %v1052_v33  ;;  %v1055_v36 = vld [vmem:[#allocation2 + $0x1e0] sm:$0xff] }
 0x1c4   : > { %1117 = vst [vmem:[#allocation6 + $0x1d0] sm:$0xff] %v1053_v34  ;;  %1118 = vst [vmem:[#allocation6 + $0x1d8] sm:$0xff] %v1054_v35  ;;  %v1056_v37 = vld [vmem:[#allocation2 + $0x1e8] sm:$0xff]  ;;  %v1057_v38 = vld [vmem:[#allocation2 + $0x1f0] sm:$0xff] }
 0x1c5   : > { %1119 = vst [vmem:[#allocation6 + $0x1e0] sm:$0xff] %v1055_v36  ;;  %1120 = vst [vmem:[#allocation6 + $0x1e8] sm:$0xff] %v1056_v37  ;;  %v1058_v48 = vld [vmem:[#allocation2 + $0x1f8] sm:$0xff] }
 0x1c6   : > { %1121 = vst [vmem:[#allocation6 + $0x1f0] sm:$0xff] %v1057_v38  ;;  %1122 = vst [vmem:[#allocation6 + $0x1f8] sm:$0xff] %v1058_v48 }
 0x1c7 PF: > { %p2320_p5 = scmp.eq.s32.totalorder %s1200_s12, 2  ;;  %s1877_s17 = smov [#allocation6]  }
 0x1c8   : > { %s1133_s24 = sshll.u32 %s1877_s17, 4  ;;  %s1134_s24 = int_to_ptr.vmem [resolvable:$true] %s1133_s24 }
 0x1c9   : > { %s1792_s26 = scalar_lea.vmem %s1134_s24, 8192  ;;  %p1799_p12 = scmp.lt.s32.totalorder %s1134_s24, %s1134_s24 }
 0x1ca   : > { %p1793_p6 = scmp.ne.s32.totalorder %s1134_s24, %s1792_s26  ;;  %p1800_p0 = scmp.lt.s32.totalorder %s1792_s26, %s1792_s26 }
 0x1cc   : > { %p1794_p8 = pnand %p1793_p6, %p2320_p5  ;;  %p1801_p1 = por %p1800_p0, %p1799_p12 }
 0x1ce   : > { %p1795_p10 = pneg %p1794_p8 }
 0x1d0   : > { %p1802_p2 = pnand %p1801_p1, %p1795_p10 }
 0x1d2   : > { %1805 = shalt.err (!%p1802_p2)
}
 0x1d3   : > { %s1806_s12 = scalar_lea.hbm %s2365_s1, 8192 }
 0x1d4   : > { %p1807_p11 = scmp.ne.s32.totalorder %s2365_s1, %s1806_s12  ;;  %p1812_p7 = scmp.lt.u32.totalorder %s1806_s12, %s2365_s1 }
 0x1d6   : > { %p1808_p13 = pnand %p1807_p11, %p2320_p5 }
 0x1d8   : > { %p1809_p3 = pneg %p1808_p13 }
 0x1da   : > { %p1814_p9 = pnand %p1812_p7, %p1809_p3 }
 0x1dc   : > { %1817 = shalt.err (!%p1814_p9)
}
 0x1dd   : > { %s1878_s4 = smov 128   ;;  %s1879_s5 = smov 8  }
 0x1de   : > { %1699 = dma.vmem_to_hbm [thread:$0]  (%p2320_p5), %s1134_s24, 8192, %s2365_s1, [#allocation5], %s1878_s4, %s1878_s4, %s1879_s5  }
 0x1df   : > { %1847 = dma.done.wait (%p2320_p5), [#allocation5], 8192  }
 0x1e0   : > { %1849 = vsyncadd (%p2320_p5), [#allocation5], 4294959104 }
 0x1e1 PF: > { %s15_s11 = sadd.s32 1, %s1872_s11   ;;  %s2424_s6 = smov %s1856_s7 }
 0x1e2   : > { %p12_p4 = scmp.ge.s32.totalorder %s15_s11, 5   ;;  %s2425_s7 = smov %s1860_s8 }
 0x1e3   : > { %s2426_s8 = smov %s1941_s18  ;;  %s2427_s9 = smov %s1868_s10 }
 0x1e4   : > { %s2428_s10 = smov %s2430_s13  ;;  %14 = sbr.rel (!%p12_p4) target bundleno = 5 (0x5), region = 74 }
 0x1eb   :  { %1149 = vsyncpa [#allocation4], 1 }
 0x1ec   :  { %1151 = vsyncpa [#allocation4 + $0x1], 1 }
 0x1ed   :  { %1152 = vsyncpa [#allocation5], 1 }
 0x1ee   :  { %1154 = vsyncpa [#allocation5 + $0x1], 1 }

</bundles_post_ra>
